<compile_context>
chip_gen: v6e
topology: v6e:2x2x1
jax: 0.10.0
libtpu: 0.0.40
codegen_flags: <defaults>
</compile_context>

<pallas_src>
import functools

import jax
import jax.numpy as jnp
from jax.experimental import pallas as pl
from jax.experimental.pallas import tpu as pltpu

STATE_DIM = 6
ACTION_DIM = 3
HIDDEN = 32
BATCH = 256
SATELLITE_DISCOUNT = 0.98

LANES = 128

# ---- augmented sizes (each hidden block carries a "ones" row in slot HIDDEN) -
AUG_HIDDEN = HIDDEN + 8          # 40: rows 0..31 = hidden, row 32 = 1, 33..39 = 0
ONES_COL_S = STATE_DIM           # lane 6 of the (8, TB) state slab carries 1.0
NSR_ONES = STATE_DIM + 1         # row/lane 7 of the nsr block carries 1.0

# ---- wk8 slab: all weights whose input (K) dim is the 8-wide state/action/nsr
W1_R0 = 0                        # (80, 8)  fused [actor-l1 ; transition-l1(state)]
W1_ROWS = 2 * AUG_HIDDEN
WTA_R0 = 80                      # (40, 8)  action -> transition hidden delta
WC1_R0 = 120                     # (40, 8)  nsr    -> critic hidden
WK8_ROWS = 160
WK8_K = 8

# ---- wk40 slab: all weights whose input (K) dim is an augmented hidden (40)
WA2_R0 = 0                       # (8, 40)  actor hidden  -> action
WNSR_R0 = 8                      # (8, 40)  trans. hidden -> [next_state ; reward ; 1]
WC2_R0 = 16                      # (8, 40)  critic hidden -> value
WK40_ROWS = 24
WK40_K = AUG_HIDDEN


def _actor_improved_value_kernel(s_ref, wk8_ref, wk40_ref, out_ref, *, neg_inv_batch):
    s = s_ref[...]                                     # (8, TB): 0-5 state^T, 6 = 1, 7 = 0

    # Aligned multiple-of-8 sublane ref slices; no lane slicing, no bias loads.
    w1 = wk8_ref[W1_R0:W1_R0 + W1_ROWS, :]             # (80, 8)
    wta = wk8_ref[WTA_R0:WTA_R0 + AUG_HIDDEN, :]       # (40, 8)
    wc1 = wk8_ref[WC1_R0:WC1_R0 + AUG_HIDDEN, :]       # (40, 8)
    wa2 = wk40_ref[WA2_R0:WA2_R0 + 8, :]               # (8, 40)
    wnsr = wk40_ref[WNSR_R0:WNSR_R0 + 8, :]            # (8, 40)
    wc2 = wk40_ref[WC2_R0:WC2_R0 + 8, :]               # (8, 40)

    # ---- fused actor-l1 + transition-l1(state part); biases folded via ones row
    z1 = jnp.dot(w1, s, preferred_element_type=jnp.float32)            # (80, TB)
    ha = jnp.maximum(z1[:AUG_HIDDEN, :], 0.0)          # (40, TB): 0-31 actor hid, 32 = 1
    action = jnp.tanh(
        jnp.dot(wa2, ha, preferred_element_type=jnp.float32))          # (8, TB): 0-2 action, rest 0
    ht = jnp.maximum(
        z1[AUG_HIDDEN:, :] + jnp.dot(wta, action, preferred_element_type=jnp.float32),
        0.0)                                           # (40, TB): 0-31 trans hid, 32 = 1

    # ---- fused next_state + reward heads (+ ones carrier in row 7) ----------
    nsr = jnp.dot(wnsr, ht, preferred_element_type=jnp.float32)        # (8, TB): 0-5 ns, 6 r, 7 = 1

    # ---- critic(next_state) --------------------------------------------------
    hc = jnp.maximum(
        jnp.dot(wc1, nsr, preferred_element_type=jnp.float32), 0.0)    # (40, TB): 32 = 1
    v = jnp.dot(wc2, hc, preferred_element_type=jnp.float32)           # (8, TB): row 0 = value

    # ---- TD combine + per-block partial sum, -1/B folded in -----------------
    improved = nsr[STATE_DIM:STATE_DIM + 1, :] + SATELLITE_DISCOUNT * v[0:1, :]   # (1, TB)
    partial = jnp.sum(improved, axis=1, keepdims=True) * neg_inv_batch             # (1, 1)
    out_ref[0] = jnp.broadcast_to(partial, (8, LANES))


def _choose_tile(batch, block_batch):
    """Pick a lane-dense batch tile. batch<=block_batch runs as a single block."""
    if batch <= block_batch:
        return batch, 1
    tb = (min(block_batch, batch) // LANES) * LANES
    while tb >= LANES:
        if batch % tb == 0:
            return tb, batch // tb
        tb -= LANES
    # TODO(synk): large batches with no multiple-of-128 divisor fall back to one
    # (possibly VMEM-heavy) block; a masked tail block would handle this cleanly.
    return batch, 1


@functools.partial(jax.jit, static_argnames=("block_batch",))
def actor_improved_value(state, wk8, wk40, *, block_batch=4096):
    batch = state.shape[0]
    tb, grid_n = _choose_tile(batch, block_batch)

    # Batch-on-lanes input slab: rows 0-5 = state^T, row 6 = 1 (bias carrier), row 7 = 0.
    s_aug = jnp.concatenate(
        [state.T.astype(jnp.float32),
         jnp.ones((1, batch), jnp.float32),
         jnp.zeros((1, batch), jnp.float32)],
        axis=0)                                                        # (8, batch)

    out = pl.pallas_call(
        functools.partial(_actor_improved_value_kernel, neg_inv_batch=-1.0 / batch),
        out_shape=jax.ShapeDtypeStruct((grid_n, 8, LANES), jnp.float32),
        grid_spec=pltpu.PrefetchScalarGridSpec(
            num_scalar_prefetch=0,
            grid=(grid_n,),
            in_specs=[
                pl.BlockSpec((8, tb), lambda i: (0, i)),               # streamed batch tile
                pl.BlockSpec((WK8_ROWS, WK8_K), lambda i: (0, 0)),     # resident weights (K=8)
                pl.BlockSpec((WK40_ROWS, WK40_K), lambda i: (0, 0)),   # resident weights (K=40)
            ],
            out_specs=pl.BlockSpec((1, 8, LANES), lambda i: (i, 0, 0)),  # per-block partial sum
        ),
        compiler_params=pltpu.CompilerParams(
            dimension_semantics=("parallel",),          # blocks are independent (v7x: 2 TCs)
            vmem_limit_bytes=32 * 1024 * 1024),
    )(s_aug, wk8, wk40)

    if grid_n == 1:
        return out[0, 0, 0]                 # -mean already applied in-kernel
    return jnp.sum(out[:, 0, 0])            # partial sums already carry the -1/B scale


def init_params(key):
    """Deterministic synthetic parameters for actor / transition / critic."""
    ks = jax.random.split(key, 16)

    def w(k, shape, fan_in):
        return (jax.random.normal(k, shape, jnp.float32) / jnp.sqrt(fan_in)).astype(jnp.float32)

    def b(k, shape):
        return (0.1 * jax.random.normal(k, shape, jnp.float32)).astype(jnp.float32)

    # actor
    wa1 = w(ks[0], (STATE_DIM, HIDDEN), STATE_DIM)
    ba1 = b(ks[1], (1, HIDDEN))
    wa2 = w(ks[2], (HIDDEN, ACTION_DIM), HIDDEN)
    ba2 = b(ks[3], (1, ACTION_DIM))
    # transition (input = concat(state, action), split into two weight blocks)
    wt_s = w(ks[4], (STATE_DIM, HIDDEN), STATE_DIM + ACTION_DIM)
    wt_a = w(ks[5], (ACTION_DIM, HIDDEN), STATE_DIM + ACTION_DIM)
    bt1 = b(ks[6], (1, HIDDEN))
    wt_ns = w(ks[7], (HIDDEN, STATE_DIM), HIDDEN)
    bt_ns = b(ks[8], (1, STATE_DIM))
    wt_r = w(ks[9], (HIDDEN, 1), HIDDEN)
    bt_r = b(ks[10], (1, 1))
    # critic
    wc1 = w(ks[11], (STATE_DIM, HIDDEN), STATE_DIM)
    bc1 = b(ks[12], (1, HIDDEN))
    wc2 = w(ks[13], (HIDDEN, 1), HIDDEN)
    bc2 = b(ks[14], (1, 1))

    return (wa1, ba1, wa2, ba2,
            wt_s, wt_a, bt1, wt_ns, bt_ns, wt_r, bt_r,
            wc1, bc1, wc2, bc2)


def pack_params(params):
    """Pack transposed, zero-padded weights (biases folded in) into two slabs."""
    (wa1, ba1, wa2, ba2,
     wt_s, wt_a, bt1, wt_ns, bt_ns, wt_r, bt_r,
     wc1, bc1, wc2, bc2) = params

    # ---- wk8: weights consuming the 8-lane inputs (state slab / action / nsr) ----
    wk8 = jnp.zeros((WK8_ROWS, WK8_K), jnp.float32)
    # W1 block rows 0..79: [actor-l1 ; transition-l1(state part)], ones carriers at 32 / 72
    wk8 = wk8.at[0:HIDDEN, 0:STATE_DIM].set(wa1.T)
    wk8 = wk8.at[0:HIDDEN, ONES_COL_S].set(ba1[0])
    wk8 = wk8.at[HIDDEN, ONES_COL_S].set(1.0)
    wk8 = wk8.at[AUG_HIDDEN:AUG_HIDDEN + HIDDEN, 0:STATE_DIM].set(wt_s.T)
    wk8 = wk8.at[AUG_HIDDEN:AUG_HIDDEN + HIDDEN, ONES_COL_S].set(bt1[0])
    wk8 = wk8.at[AUG_HIDDEN + HIDDEN, ONES_COL_S].set(1.0)
    # W_ta block rows 80..119: action (lanes 0-2) -> transition hidden delta (no bias)
    wk8 = wk8.at[WTA_R0:WTA_R0 + HIDDEN, 0:ACTION_DIM].set(wt_a.T)
    # W_c1 block rows 120..159: nsr (lanes 0-5 = ns, 6 = reward unused, 7 = 1) -> critic hidden
    wk8 = wk8.at[WC1_R0:WC1_R0 + HIDDEN, 0:STATE_DIM].set(wc1.T)
    wk8 = wk8.at[WC1_R0:WC1_R0 + HIDDEN, NSR_ONES].set(bc1[0])
    wk8 = wk8.at[WC1_R0 + HIDDEN, NSR_ONES].set(1.0)

    # ---- wk40: weights consuming an augmented hidden (lanes 0-31 hidden, 32 = 1) ----
    wk40 = jnp.zeros((WK40_ROWS, WK40_K), jnp.float32)
    # W_a2 block rows 0..7: actor hidden -> action
    wk40 = wk40.at[WA2_R0:WA2_R0 + ACTION_DIM, 0:HIDDEN].set(wa2.T)
    wk40 = wk40.at[WA2_R0:WA2_R0 + ACTION_DIM, HIDDEN].set(ba2[0])
    # W_nsr block rows 8..15: transition hidden -> [next_state ; reward ; ones]
    wk40 = wk40.at[WNSR_R0:WNSR_R0 + STATE_DIM, 0:HIDDEN].set(wt_ns.T)
    wk40 = wk40.at[WNSR_R0:WNSR_R0 + STATE_DIM, HIDDEN].set(bt_ns[0])
    wk40 = wk40.at[WNSR_R0 + STATE_DIM, 0:HIDDEN].set(wt_r[:, 0])
    wk40 = wk40.at[WNSR_R0 + STATE_DIM, HIDDEN].set(bt_r[0, 0])
    wk40 = wk40.at[WNSR_R0 + NSR_ONES, HIDDEN].set(1.0)
    # W_c2 block rows 16..23: critic hidden -> value
    wk40 = wk40.at[WC2_R0, 0:HIDDEN].set(wc2[:, 0])
    wk40 = wk40.at[WC2_R0, HIDDEN].set(bc2[0, 0])
    return wk8, wk40


def reference_forward(state, params):
    """Pure-JAX reference matching the original module math (sanity check)."""
    (wa1, ba1, wa2, ba2,
     wt_s, wt_a, bt1, wt_ns, bt_ns, wt_r, bt_r,
     wc1, bc1, wc2, bc2) = params
    ha = jnp.maximum(state @ wa1 + ba1, 0.0)
    action = jnp.tanh(ha @ wa2 + ba2)
    ht = jnp.maximum(state @ wt_s + action @ wt_a + bt1, 0.0)
    next_state = ht @ wt_ns + bt_ns
    reward = ht @ wt_r + bt_r
    hc = jnp.maximum(next_state @ wc1 + bc1, 0.0)
    value = hc @ wc2 + bc2
    improved = reward + SATELLITE_DISCOUNT * value
    return -jnp.mean(improved)


# TODO(synk): the `parameters()` override (training-only API) has no
# inference-time equivalent and is not translated.

if __name__ == "__main__":
    key = jax.random.PRNGKey(0)
    k_state, k_params = jax.random.split(key)
    state = jax.random.normal(k_state, (BATCH, STATE_DIM), jnp.float32)
    params = init_params(k_params)
    wk8, wk40 = pack_params(params)

    ref = reference_forward(state, params)

    # Default path: BATCH=256 runs as a single grid step.
    out = jax.block_until_ready(actor_improved_value(state, wk8, wk40))
    assert jnp.allclose(out, ref, atol=1e-4, rtol=1e-4), (out, ref)

    # Multi-block path: exercises the "parallel" per-block partial sums.
    out_blocked = jax.block_until_ready(
        actor_improved_value(state, wk8, wk40, block_batch=128))
    assert jnp.allclose(out_blocked, ref, atol=1e-4, rtol=1e-4), (out_blocked, ref)

    print("KERNEL_OK")
</pallas_src>

<mosaic_0001>
module attributes {stable_mosaic.version = 11 : i64} {
  func.func @_actor_improved_value_kernel(%arg0: i32, %arg1: memref<8x256xf32, #tpu.memory_space<vmem>>, %arg2: memref<160x8xf32, #tpu.memory_space<vmem>>, %arg3: memref<24x40xf32, #tpu.memory_space<vmem>>, %arg4: memref<1x8x128xf32, #tpu.memory_space<vmem>>) attributes {dimension_semantics = [#tpu.dimension_semantics<parallel>], iteration_bounds = array<i64: 1>, scalar_prefetch = 0 : i64, scratch_operands = 0 : i64, tpu.core_type = #tpu.core_type<tc>, window_params = [{transform_indices = @transform_0, window_bounds = array<i64: 8, 256>}, {pipeline_mode = #tpu.pipeline_mode<synchronous>, transform_indices = @transform_1, window_bounds = array<i64: 160, 8>}, {pipeline_mode = #tpu.pipeline_mode<synchronous>, transform_indices = @transform_2, window_bounds = array<i64: 24, 40>}, {transform_indices = @transform_3, window_bounds = array<i64: 1, 8, 128>}]} {
    %c0 = arith.constant 0 : index
    %c0_0 = arith.constant 0 : index
    %0 = vector.load %arg1[%c0, %c0_0] : memref<8x256xf32, #tpu.memory_space<vmem>>, vector<8x256xf32>
    %c0_1 = arith.constant 0 : index
    %c0_2 = arith.constant 0 : index
    %1 = vector.load %arg2[%c0_1, %c0_2] : memref<160x8xf32, #tpu.memory_space<vmem>>, vector<80x8xf32>
    %c80 = arith.constant 80 : index
    %c0_3 = arith.constant 0 : index
    %2 = vector.load %arg2[%c80, %c0_3] : memref<160x8xf32, #tpu.memory_space<vmem>>, vector<40x8xf32>
    %c120 = arith.constant 120 : index
    %c0_4 = arith.constant 0 : index
    %3 = vector.load %arg2[%c120, %c0_4] : memref<160x8xf32, #tpu.memory_space<vmem>>, vector<40x8xf32>
    %c0_5 = arith.constant 0 : index
    %c0_6 = arith.constant 0 : index
    %4 = vector.load %arg3[%c0_5, %c0_6] : memref<24x40xf32, #tpu.memory_space<vmem>>, vector<8x40xf32>
    %c8 = arith.constant 8 : index
    %c0_7 = arith.constant 0 : index
    %5 = vector.load %arg3[%c8, %c0_7] : memref<24x40xf32, #tpu.memory_space<vmem>>, vector<8x40xf32>
    %c16 = arith.constant 16 : index
    %c0_8 = arith.constant 0 : index
    %6 = vector.load %arg3[%c16, %c0_8] : memref<24x40xf32, #tpu.memory_space<vmem>>, vector<8x40xf32>
    %cst = arith.constant dense<0.000000e+00> : vector<80x256xf32>
    %7 = tpu.matmul %1, %0, %cst {dimension_numbers = #tpu.dot_dimension_numbers<[1], [0], [0], [1], [0, 0, 1, 1], [], []>} : vector<80x8xf32>, vector<8x256xf32>, vector<80x256xf32> -> vector<80x256xf32>
    %8 = vector.extract_strided_slice %7 {offsets = [0, 0], sizes = [40, 256], strides = [1, 1]} : vector<80x256xf32> to vector<40x256xf32>
    %cst_9 = arith.constant 0.000000e+00 : f32
    %9 = vector.broadcast %cst_9 : f32 to vector<40x256xf32>
    %10 = arith.maximumf %8, %9 : vector<40x256xf32>
    %cst_10 = arith.constant dense<0.000000e+00> : vector<8x256xf32>
    %11 = tpu.matmul %4, %10, %cst_10 {dimension_numbers = #tpu.dot_dimension_numbers<[1], [0], [0], [1], [0, 0, 1, 1], [], []>} : vector<8x40xf32>, vector<40x256xf32>, vector<8x256xf32> -> vector<8x256xf32>
    %12 = math.tanh %11 : vector<8x256xf32>
    %13 = vector.extract_strided_slice %7 {offsets = [40, 0], sizes = [40, 256], strides = [1, 1]} : vector<80x256xf32> to vector<40x256xf32>
    %cst_11 = arith.constant dense<0.000000e+00> : vector<40x256xf32>
    %14 = tpu.matmul %2, %12, %cst_11 {dimension_numbers = #tpu.dot_dimension_numbers<[1], [0], [0], [1], [0, 0, 1, 1], [], []>} : vector<40x8xf32>, vector<8x256xf32>, vector<40x256xf32> -> vector<40x256xf32>
    %15 = arith.addf %13, %14 : vector<40x256xf32>
    %cst_12 = arith.constant 0.000000e+00 : f32
    %16 = vector.broadcast %cst_12 : f32 to vector<40x256xf32>
    %17 = arith.maximumf %15, %16 : vector<40x256xf32>
    %cst_13 = arith.constant dense<0.000000e+00> : vector<8x256xf32>
    %18 = tpu.matmul %5, %17, %cst_13 {dimension_numbers = #tpu.dot_dimension_numbers<[1], [0], [0], [1], [0, 0, 1, 1], [], []>} : vector<8x40xf32>, vector<40x256xf32>, vector<8x256xf32> -> vector<8x256xf32>
    %cst_14 = arith.constant dense<0.000000e+00> : vector<40x256xf32>
    %19 = tpu.matmul %3, %18, %cst_14 {dimension_numbers = #tpu.dot_dimension_numbers<[1], [0], [0], [1], [0, 0, 1, 1], [], []>} : vector<40x8xf32>, vector<8x256xf32>, vector<40x256xf32> -> vector<40x256xf32>
    %cst_15 = arith.constant 0.000000e+00 : f32
    %20 = vector.broadcast %cst_15 : f32 to vector<40x256xf32>
    %21 = arith.maximumf %19, %20 : vector<40x256xf32>
    %cst_16 = arith.constant dense<0.000000e+00> : vector<8x256xf32>
    %22 = tpu.matmul %6, %21, %cst_16 {dimension_numbers = #tpu.dot_dimension_numbers<[1], [0], [0], [1], [0, 0, 1, 1], [], []>} : vector<8x40xf32>, vector<40x256xf32>, vector<8x256xf32> -> vector<8x256xf32>
    %23 = vector.extract_strided_slice %18 {offsets = [6, 0], sizes = [1, 256], strides = [1, 1]} : vector<8x256xf32> to vector<1x256xf32>
    %24 = vector.extract_strided_slice %22 {offsets = [0, 0], sizes = [1, 256], strides = [1, 1]} : vector<8x256xf32> to vector<1x256xf32>
    %cst_17 = arith.constant 9.800000e-01 : f32
    %25 = vector.broadcast %cst_17 : f32 to vector<1x256xf32>
    %26 = arith.mulf %25, %24 : vector<1x256xf32>
    %27 = arith.addf %23, %26 : vector<1x256xf32>
    %cst_18 = arith.constant dense<0.000000e+00> : vector<1xf32>
    %28 = vector.multi_reduction <add>, %27, %cst_18 [1] : vector<1x256xf32> to vector<1xf32>
    %29 = vector.shape_cast %28 : vector<1xf32> to vector<1x1xf32>
    %cst_19 = arith.constant -3.906250e-03 : f32
    %30 = vector.broadcast %cst_19 : f32 to vector<1x1xf32>
    %31 = arith.mulf %29, %30 : vector<1x1xf32>
    %32 = vector.shape_cast %31 : vector<1x1xf32> to vector<1x1xf32>
    %33 = vector.broadcast %32 : vector<1x1xf32> to vector<8x128xf32>
    %c0_20 = arith.constant 0 : index
    %c0_21 = arith.constant 0 : index
    %c0_22 = arith.constant 0 : index
    %34 = vector.load %arg4[%c0_20, %c0_21, %c0_22] : memref<1x8x128xf32, #tpu.memory_space<vmem>>, vector<1x8x128xf32>
    %35 = vector.shape_cast %34 : vector<1x8x128xf32> to vector<8x128xf32>
    %36 = vector.shape_cast %33 : vector<8x128xf32> to vector<1x8x128xf32>
    tpu.vector_store %arg4[%c0_20, %c0_21, %c0_22], %36 {strides = array<i32>} : memref<1x8x128xf32, #tpu.memory_space<vmem>>, vector<1x8x128xf32>,
    return
  }
  func.func @transform_0(%arg0: i32) -> (i32, i32) {
    %c0_i32 = arith.constant 0 : i32
    %c0_i32_0 = arith.constant 0 : i32
    return %c0_i32, %arg0 : i32, i32
  }
  func.func @transform_1(%arg0: i32) -> (i32, i32) {
    %c0_i32 = arith.constant 0 : i32
    %c0_i32_0 = arith.constant 0 : i32
    %c0_i32_1 = arith.constant 0 : i32
    return %c0_i32, %c0_i32_0 : i32, i32
  }
  func.func @transform_2(%arg0: i32) -> (i32, i32) {
    %c0_i32 = arith.constant 0 : i32
    %c0_i32_0 = arith.constant 0 : i32
    %c0_i32_1 = arith.constant 0 : i32
    return %c0_i32, %c0_i32_0 : i32, i32
  }
  func.func @transform_3(%arg0: i32) -> (i32, i32, i32) {
    %c0_i32 = arith.constant 0 : i32
    %c0_i32_0 = arith.constant 0 : i32
    %c0_i32_1 = arith.constant 0 : i32
    return %arg0, %c0_i32, %c0_i32_0 : i32, i32, i32
  }
}

</mosaic_0001>

<bundles_post_ra>
// kernel: actor_improved_value.1
= control target key start
LH: loop header
LB: loop body
LE: loop exit
PB: predicated region body
PF: predicated region fallthrough
CT: control target
= control target key end

     0   :  { %v734_v2 = vmov 0.0   ;;  %vm39_vm0 = vcmask 64512   ;;  %vm205_vm1 = vcmask 326656   ;;  %vm690_vm2 = vcmask 1046534   ;;  %s879_s0 = inlined_call_operand.vmem [shape: f32[8,256], index: 0, kind: input, shape index: {}]   ;;  %s880_s1 = inlined_call_operand.vmem [shape: f32[160,8], index: 1, kind: input, shape index: {}]   ;;  %s881_s2 = inlined_call_operand.vmem [shape: f32[24,40], index: 2, kind: input, shape index: {}]   ;;  %s882_s3 = inlined_call_operand.vmem [shape: f32[1,8,128], index: 3, kind: output, shape index: {}]  }
   0x1   :  { %v15_v0 = vld [vmem:[%s879_s0 + $0x8] sm:$0xff]  ;;  %v14_v1 = vld [vmem:[%s879_s0] sm:$0xff]  ;;  %134 = vmatprep.mubr.f32.mxu0 %v734_v2  ;;  %361 = vmatprep.mubr.f32.mxu1 %v734_v2  ;;  %v18_v5 = vld [vmem:[%s880_s1 + $0x10] sm:$0xff] }
   0x2   :  { %v16_v3 = vld [vmem:[%s880_s1] sm:$0xff]  ;;  %100 = vmatprep.subr.mxu0 %v15_v0  ;;  %v17_v4 = vld [vmem:[%s880_s1 + $0x8] sm:$0xff]  ;;  %v19_v6 = vld [vmem:[%s880_s1 + $0x18] sm:$0xff] }
   0x3   :  { %101 = vmatpush1.msra.mxu0 %v14_v1  ;;  %v20_v7 = vld [vmem:[%s880_s1 + $0x20] sm:$0xff]  ;;  %v21_v8 = vld [vmem:[%s880_s1 + $0x28] sm:$0xff]  ;;  %v22_v9 = vld [vmem:[%s880_s1 + $0x30] sm:$0xff] }
   0x4   :  { %706 = vmatmul.mubr.msk.f32.vlgmr.msra.gmra.mxu0 %vm39_vm0, %v16_v3  ;;  %v23_v10 = vld [vmem:[%s880_s1 + $0x38] sm:$0xff]  ;;  %v24_v11 = vld [vmem:[%s880_s1 + $0x40] sm:$0xff]  ;;  %v25_v12 = vld [vmem:[%s880_s1 + $0x48] sm:$0xff] }
   0x5   :  { %140 = vmatprep.mubr.f32.mxu0 %v734_v2  ;;  %v36_v33 = vld [vmem:[%s881_s2] sm:$0xff]  ;;  %v26_v47 = vld [vmem:[%s880_s1 + $0x50] sm:$0xff]  ;;  %v27_v49 = vld [vmem:[%s880_s1 + $0x58] sm:$0xff] }
   0x6   :  { %v28_v50 = vld [vmem:[%s880_s1 + $0x60] sm:$0xff]  ;;  %v29_v51 = vld [vmem:[%s880_s1 + $0x68] sm:$0xff]  ;;  %v30_v52 = vld [vmem:[%s880_s1 + $0x70] sm:$0xff] }
   0x8   :  { %707 = vmatmul.mubr.msk.f32.gmra.mxu0 %vm39_vm0, %v17_v4 }
   0x9   :  { %146 = vmatprep.mubr.f32.mxu0 %v734_v2 }
   0xc   :  { %708 = vmatmul.mubr.msk.f32.gmra.mxu0 %vm39_vm0, %v18_v5 }
   0xd   :  { %152 = vmatprep.mubr.f32.mxu0 %v734_v2 }
  0x10   :  { %709 = vmatmul.mubr.msk.f32.gmra.mxu0 %vm39_vm0, %v19_v6 }
  0x11   :  { %158 = vmatprep.mubr.f32.mxu0 %v734_v2 }
  0x14   :  { %710 = vmatmul.mubr.msk.f32.gmra.mxu0 %vm39_vm0, %v20_v7 }
  0x15   :  { %164 = vmatprep.mubr.f32.mxu0 %v734_v2 }
  0x18   :  { %711 = vmatmul.mubr.msk.f32.gmra.mxu0 %vm39_vm0, %v21_v8 }
  0x19   :  { %170 = vmatprep.mubr.f32.mxu0 %v734_v2 }
  0x1c   :  { %712 = vmatmul.mubr.msk.f32.gmra.mxu0 %vm39_vm0, %v22_v9 }
  0x1d   :  { %176 = vmatprep.mubr.f32.mxu0 %v734_v2 }
  0x20   :  { %713 = vmatmul.mubr.msk.f32.gmra.mxu0 %vm39_vm0, %v23_v10 }
  0x21   :  { %182 = vmatprep.mubr.f32.mxu0 %v734_v2 }
  0x24   :  { %714 = vmatmul.mubr.msk.f32.gmra.mxu0 %vm39_vm0, %v24_v11 }
  0x25   :  { %188 = vmatprep.mubr.f32.mxu0 %v734_v2 }
  0x28   :  { %715 = vmatmul.mubr.msk.f32.gmra.mxu0 %vm39_vm0, %v25_v12 }
  0x29   :  { %273 = vmatprep.mubr.f32.mxu0 %v734_v2 }
  0xc4   :  { %v136_v13 = vpop.f32.mrf.mxu0 }
  0xc5   :  { %v195_v32 = vmax.f32 %v136_v13, 0.0 }
  0xc6   :  { %v138_v14 = vpop.f32.mrf.mxu0 }
  0xc7   :  { %v196_v31 = vmax.f32 %v138_v14, 0.0 }
  0xc8   :  { %v142_v15 = vpop.f32.mrf.mxu0 }
  0xc9   :  { %v197_v30 = vmax.f32 %v142_v15, 0.0 }
  0xca   :  { %v144_v16 = vpop.f32.mrf.mxu0 }
  0xcb   :  { %v198_v29 = vmax.f32 %v144_v16, 0.0 }
  0xcc   :  { %v148_v17 = vpop.f32.mrf.mxu0 }
  0xcd   :  { %v199_v28 = vmax.f32 %v148_v17, 0.0 }
  0xce   :  { %v150_v18 = vpop.f32.mrf.mxu0 }
  0xcf   :  { %v200_v27 = vmax.f32 %v150_v18, 0.0 }
  0xd0   :  { %v154_v19 = vpop.f32.mrf.mxu0 }
  0xd1   :  { %v201_v26 = vmax.f32 %v154_v19, 0.0 }
  0xd2   :  { %v156_v20 = vpop.f32.mrf.mxu0 }
  0xd3   :  { %v202_v25 = vmax.f32 %v156_v20, 0.0  ;;  %v37_v20 = vld [vmem:[%s881_s2 + $0x8] sm:$0xff] }
  0xd4   :  { %v160_v21 = vpop.f32.mrf.mxu0 }
  0xd5   :  { %v203_v24 = vmax.f32 %v160_v21, 0.0 }
  0xd6   :  { %v162_v22 = vpop.f32.mrf.mxu0 }
  0xd7   :  { %v204_v23 = vmax.f32 %v162_v22, 0.0 }
  0xd8   :  { %v166_v34 = vpop.f32.mrf.mxu0 }
  0xd9   :  { %231 = vmatprep.subr.mxu0 %v204_v23  ;;  %v31_v23 = vld [vmem:[%s880_s1 + $0x78] sm:$0xff] }
  0xda   :  { %232 = vmatpush1.msra.mxu0 %v203_v24  ;;  %v168_v35 = vpop.f32.mrf.mxu0  ;;  %v32_v24 = vld [vmem:[%s880_s1 + $0x80] sm:$0xff] }
  0xdb   :  { %233 = vmatprep.subr.mxu0 %v202_v25  ;;  %v33_v25 = vld [vmem:[%s880_s1 + $0x88] sm:$0xff] }
  0xdc   :  { %234 = vmatpush1.msra.mxu0 %v201_v26  ;;  %v172_v36 = vpop.f32.mrf.mxu0  ;;  %v34_v26 = vld [vmem:[%s880_s1 + $0x90] sm:$0xff] }
  0xdd   :  { %235 = vmatprep.subr.mxu0 %v200_v27  ;;  %v35_v27 = vld [vmem:[%s880_s1 + $0x98] sm:$0xff] }
  0xde   :  { %236 = vmatpush1.msra.mxu0 %v199_v28  ;;  %v174_v37 = vpop.f32.mrf.mxu0 }
  0xdf   :  { %237 = vmatprep.subr.mxu0 %v198_v29 }
  0xe0   :  { %238 = vmatpush1.msra.mxu0 %v197_v30  ;;  %v178_v38 = vpop.f32.mrf.mxu0 }
  0xe1   :  { %239 = vmatprep.subr.mxu0 %v196_v31 }
  0xe2   :  { %240 = vmatpush1.msra.mxu0 %v195_v32  ;;  %v180_v39 = vpop.f32.mrf.mxu0 }
  0xe3   :  { %716 = vmatmul.mubr.msk.f32.vlgmr.msra.gmra.mxu0 %vm205_vm1, %v36_v33 }
  0xe4   :  { %v184_v40 = vpop.f32.mrf.mxu0 }
  0xe6   :  { %v186_v41 = vpop.f32.mrf.mxu0 }
  0xe8   :  { %v190_v42 = vpop.f32.mrf.mxu0 }
  0xea   :  { %v192_v43 = vpop.f32.mrf.mxu0 }
 0x1a3   :  { %v275_v44 = vpop.f32.mrf.mxu0 }
 0x1a5   :  { %v277_v45 = vpop.f32.mrf.mxu0 }
 0x1a6   :  { %730 = vtanh.f32 %v277_v45 }
 0x1a7   :  { %732 = vtanh.f32 %v275_v44 }
 0x1b3   :  { %v731_v46 = vpop.eup %730 }
 0x1b4   :  { %v733_v48 = vpop.eup %732  ;;  %327 = vmatprep.subr.mxu1 %v731_v46 }
 0x1b5   :  { %328 = vmatpush1.msra.mxu1 %v733_v48 }
 0x1b6   :  { %717 = vmatmul.mubr.msk.f32.vlgmr.msra.gmra.mxu1 %vm39_vm0, %v26_v47  ;;  %v38_v47 = vld [vmem:[%s881_s2 + $0x10] sm:$0xff] }
 0x1b7   :  { %367 = vmatprep.mubr.f32.mxu1 %v734_v2 }
 0x1ba   :  { %718 = vmatmul.mubr.msk.f32.gmra.mxu1 %vm39_vm0, %v27_v49 }
 0x1bb   :  { %373 = vmatprep.mubr.f32.mxu1 %v734_v2 }
 0x1be   :  { %719 = vmatmul.mubr.msk.f32.gmra.mxu1 %vm39_vm0, %v28_v50 }
 0x1bf   :  { %379 = vmatprep.mubr.f32.mxu1 %v734_v2 }
 0x1c2   :  { %720 = vmatmul.mubr.msk.f32.gmra.mxu1 %vm39_vm0, %v29_v51 }
 0x1c3   :  { %385 = vmatprep.mubr.f32.mxu1 %v734_v2 }
 0x1c6   :  { %721 = vmatmul.mubr.msk.f32.gmra.mxu1 %vm39_vm0, %v30_v52 }
 0x1c7   :  { %479 = vmatprep.mubr.f32.mxu1 %v734_v2 }
 0x276   :  { %v363_v53 = vpop.f32.mrf.mxu1 }
 0x277   :  { %v392_v14 = vadd.f32 %v363_v53, %v166_v34 }
 0x278   :  { %v365_v54 = vpop.f32.mrf.mxu1 }
 0x279   :  { %v393_v12 = vadd.f32 %v365_v54, %v168_v35  ;;  %v402_v19 = vmax.f32 %v392_v14, 0.0 }
 0x27a   :  { %v369_v55 = vpop.f32.mrf.mxu1 }
 0x27b   :  { %v394_v10 = vadd.f32 %v369_v55, %v172_v36  ;;  %v403_v18 = vmax.f32 %v393_v12, 0.0 }
 0x27c   :  { %v371_v56 = vpop.f32.mrf.mxu1 }
 0x27d   :  { %v395_v8 = vadd.f32 %v371_v56, %v174_v37  ;;  %v404_v17 = vmax.f32 %v394_v10, 0.0 }
 0x27e   :  { %v375_v57 = vpop.f32.mrf.mxu1 }
 0x27f   :  { %v396_v6 = vadd.f32 %v375_v57, %v178_v38  ;;  %v405_v16 = vmax.f32 %v395_v8, 0.0 }
 0x280   :  { %v377_v58 = vpop.f32.mrf.mxu1 }
 0x281   :  { %v397_v4 = vadd.f32 %v377_v58, %v180_v39  ;;  %v406_v15 = vmax.f32 %v396_v6, 0.0 }
 0x282   :  { %v381_v59 = vpop.f32.mrf.mxu1 }
 0x283   :  { %v398_v3 = vadd.f32 %v381_v59, %v184_v40  ;;  %v407_v13 = vmax.f32 %v397_v4, 0.0  ;;  %v697_v59 = vlaneseq }
 0x284   :  { %v383_v60 = vpop.f32.mrf.mxu1 }
 0x285   :  { %v399_v0 = vadd.f32 %v383_v60, %v186_v41  ;;  %v408_v11 = vmax.f32 %v398_v3, 0.0  ;;  %v698_v60 = vshrl.u32 %v697_v59, 7 }
 0x286   :  { %v387_v61 = vpop.f32.mrf.mxu1 }
 0x287   :  { %v400_v62 = vadd.f32 %v387_v61, %v190_v42  ;;  %v409_v9 = vmax.f32 %v399_v0, 0.0  ;;  %v699_v61 = vsub.s32 6, %v698_v60 }
 0x288   :  { %v389_v63 = vpop.f32.mrf.mxu1 }
 0x289   :  { %v401_v1 = vadd.f32 %v389_v63, %v192_v43  ;;  %v410_v7 = vmax.f32 %v400_v62, 0.0 }
 0x28b   :  { %v411_v5 = vmax.f32 %v401_v1, 0.0 }
 0x28d   :  { %437 = vmatprep.subr.mxu1 %v411_v5 }
 0x28e   :  { %438 = vmatpush1.msra.mxu1 %v410_v7 }
 0x28f   :  { %439 = vmatprep.subr.mxu1 %v409_v9 }
 0x290   :  { %440 = vmatpush1.msra.mxu1 %v408_v11 }
 0x291   :  { %441 = vmatprep.subr.mxu1 %v407_v13 }
 0x292   :  { %442 = vmatpush1.msra.mxu1 %v406_v15 }
 0x293   :  { %443 = vmatprep.subr.mxu1 %v405_v16 }
 0x294   :  { %444 = vmatpush1.msra.mxu1 %v404_v17 }
 0x295   :  { %445 = vmatprep.subr.mxu1 %v403_v18 }
 0x296   :  { %446 = vmatpush1.msra.mxu1 %v402_v19 }
 0x297   :  { %722 = vmatmul.mubr.msk.f32.vlgmr.msra.gmra.mxu1 %vm205_vm1, %v37_v20 }
 0x298   :  { %565 = vmatprep.mubr.f32.mxu1 %v734_v2 }
 0x357   :  { %v481_v21 = vpop.f32.mrf.mxu1 }
 0x359   :  { %v483_v22 = vpop.f32.mrf.mxu1 }
 0x35a   :  { %531 = vmatprep.subr.mxu1 %v483_v22 }
 0x35b   :  { %532 = vmatpush1.msra.mxu1 %v481_v21 }
 0x35c   :  { %723 = vmatmul.mubr.msk.f32.vlgmr.msra.gmra.mxu1 %vm39_vm0, %v31_v23 }
 0x35d   :  { %571 = vmatprep.mubr.f32.mxu1 %v734_v2 }
 0x360   :  { %724 = vmatmul.mubr.msk.f32.gmra.mxu1 %vm39_vm0, %v32_v24 }
 0x361   :  { %577 = vmatprep.mubr.f32.mxu1 %v734_v2 }
 0x364   :  { %725 = vmatmul.mubr.msk.f32.gmra.mxu1 %vm39_vm0, %v33_v25 }
 0x365   :  { %583 = vmatprep.mubr.f32.mxu1 %v734_v2 }
 0x368   :  { %726 = vmatmul.mubr.msk.f32.gmra.mxu1 %vm39_vm0, %v34_v26 }
 0x369   :  { %589 = vmatprep.mubr.f32.mxu1 %v734_v2 }
 0x36c   :  { %727 = vmatmul.mubr.msk.f32.gmra.mxu1 %vm39_vm0, %v35_v27 }
 0x36d   :  { %673 = vmatprep.mubr.f32.mxu1 %v734_v2 }
 0x41c   :  { %v567_v28 = vpop.f32.mrf.mxu1 }
 0x41d   :  { %v596_v46 = vmax.f32 %v567_v28, 0.0 }
 0x41e   :  { %v569_v29 = vpop.f32.mrf.mxu1 }
 0x41f   :  { %v597_v45 = vmax.f32 %v569_v29, 0.0 }
 0x420   :  { %v573_v30 = vpop.f32.mrf.mxu1 }
 0x421   :  { %v598_v44 = vmax.f32 %v573_v30, 0.0 }
 0x422   :  { %v575_v31 = vpop.f32.mrf.mxu1 }
 0x423   :  { %v599_v2 = vmax.f32 %v575_v31, 0.0 }
 0x424   :  { %v579_v32 = vpop.f32.mrf.mxu1 }
 0x425   :  { %v600_v43 = vmax.f32 %v579_v32, 0.0 }
 0x426   :  { %v581_v33 = vpop.f32.mrf.mxu1 }
 0x427   :  { %v601_v42 = vmax.f32 %v581_v33, 0.0 }
 0x428   :  { %v585_v34 = vpop.f32.mrf.mxu1 }
 0x429   :  { %v602_v41 = vmax.f32 %v585_v34, 0.0 }
 0x42a   :  { %v587_v35 = vpop.f32.mrf.mxu1 }
 0x42b   :  { %v603_v40 = vmax.f32 %v587_v35, 0.0 }
 0x42c   :  { %v591_v36 = vpop.f32.mrf.mxu1 }
 0x42d   :  { %v604_v39 = vmax.f32 %v591_v36, 0.0 }
 0x42e   :  { %v593_v37 = vpop.f32.mrf.mxu1 }
 0x42f   :  { %v605_v38 = vmax.f32 %v593_v37, 0.0 }
 0x431   :  { %631 = vmatprep.subr.mxu1 %v605_v38 }
 0x432   :  { %632 = vmatpush1.msra.mxu1 %v604_v39 }
 0x433   :  { %633 = vmatprep.subr.mxu1 %v603_v40 }
 0x434   :  { %634 = vmatpush1.msra.mxu1 %v602_v41 }
 0x435   :  { %635 = vmatprep.subr.mxu1 %v601_v42 }
 0x436   :  { %636 = vmatpush1.msra.mxu1 %v600_v43 }
 0x437   :  { %637 = vmatprep.subr.mxu1 %v599_v2 }
 0x438   :  { %638 = vmatpush1.msra.mxu1 %v598_v44 }
 0x439   :  { %639 = vmatprep.subr.mxu1 %v597_v45 }
 0x43a   :  { %640 = vmatpush1.msra.mxu1 %v596_v46 }
 0x43b   :  { %728 = vmatmul.mubr.msk.f32.vlgmr.msra.gmra.mxu1 %vm205_vm1, %v38_v47 }
 0x4fb   :  { %v675_v48 = vpop.f32.mrf.mxu1 }
 0x4fc   :  { %v680_v49 = vmul.f32 0.98, %v675_v48 }
 0x4fd   :  { %v677_v50 = vpop.f32.mrf.mxu1 }
 0x4fe   :  { %v684_v51 = vrot.slane %v680_v49, 2  ;;  %v681_v52 = vmul.f32 0.98, %v677_v50 }
 0x500   :  { %v685_v53 = vrot.slane %v681_v52, 2  ;;  %v688_v54 = vadd.f32 %v684_v51, %v481_v21 }
 0x502   :  { %v689_v55 = vadd.f32 %v685_v53, %v483_v22  ;;  %v691_v56 = vsel %vm690_vm2, %v688_v54, 0.0 }
 0x504   :  { %v692_v57 = vsel %vm690_vm2, %v689_v55, 0.0 }
 0x505   :  { %v693_v58 = vadd.f32 %v692_v57, %v691_v56 }
 0x507   :  { %694 = vadd.xlane.f32.xlu0 %v693_v58 }
 0x590   :  { %v695_v62 = vpop.xlane.xlu0 %694 }
 0x591   :  { %v696_v63 = vmul.f32 -0.00390625, %v695_v62 }
 0x593   :  { %v700_v0 = vrot.slane %v696_v63, %v699_v61 }
 0x595   :  { %701 = vst [vmem:[%s882_s3] sm:$0xff] %v700_v0 }

</bundles_post_ra>
